<compile_context>
chip_gen: v6e
topology: v6e:2x2x1
jax: 0.10.0
libtpu: 0.0.40
codegen_flags: <defaults>
</compile_context>

<pallas_src>
import functools

import jax
import jax.numpy as jnp
from jax import lax
from jax.experimental import pallas as pl
from jax.experimental.pallas import tpu as pltpu

LANES = 128
SUBLANES = 8
MAX_TILE_ROWS = 8192   # (8192, 128) f32 = 4 MiB per input stream per buffer.


def _vmem_capacity_bytes():
    try:
        return int(pltpu.get_tpu_info().vmem_capacity_bytes)
    except Exception:
        return 64 << 20   # conservative fallback: v7x per-TensorCore VMEM


def _num_tensorcores():
    # v7x has 2 TensorCores per chip; v5e/v6e have 1.  A core split only pays
    # off on v7x — on single-TC chips it is just a redundant serial loop.
    try:
        kind = jax.devices()[0].device_kind.lower()
    except Exception:
        return 1
    return 2 if "v7" in kind else 1


def _focal_loss_kernel(pred_ref, tgt_ref, out_ref, *, tile_rows, num_tiles,
                       tiles_per_core, valid_in_last, alpha, gamma):
    """One (tile_rows, 128) tile per grid step; accumulates per-lane sums."""
    c = pl.program_id(0)            # core-split axis
    i = pl.program_id(1)            # streaming reduction axis ("arbitrary")
    tile_idx = c * tiles_per_core + i

    @pl.when(i == 0)
    def _init():
        out_ref[...] = jnp.zeros_like(out_ref)

    # Tiles past the end of this core's (unevenly split) range are clamped by
    # the index_map to an in-bounds block; skip their compute entirely.
    @pl.when(tile_idx < num_tiles)
    def _compute():
        x = pred_ref[...].astype(jnp.float32)   # logits
        t = tgt_ref[...].astype(jnp.float32)    # targets in [0, 1]

        # exp(-|x|) is shared between the stable BCE-with-logits term and the
        # sigmoid (one exp per element on the single EUP slot).
        e = jnp.exp(-jnp.abs(x))
        ce = jnp.maximum(x, 0.0) - x * t + jnp.log1p(e)
        # sigmoid(x) = [x>=0 ? 1 : e] / (1+e).  approx vrcp is one EUP push
        # and drops the exact divide's VPU Newton-refinement FMAs.
        p = jnp.where(x >= 0.0, 1.0, e) * pl.reciprocal(1.0 + e, approx=True)

        p_t = p * t + (1.0 - p) * (1.0 - t)
        u = 1.0 - p_t
        g_int = int(gamma)
        if float(gamma) == 0.0:
            loss = ce
        elif float(gamma) == float(g_int) and 1 <= g_int <= 8:
            # Integer gamma (incl. default 2.0): unrolled multiplies starting
            # from u itself (gamma=2 -> u*u), no jnp.power, no ones_like.
            mod = u
            for _ in range(g_int - 1):
                mod = mod * u
            loss = ce * mod
        else:
            # Clamp avoids NaN from tiny negative (1 - p_t) when p_t ~ 1.
            loss = ce * jnp.power(jnp.maximum(u, 0.0), gamma)

        if alpha >= 0.0:
            # alpha*t + (1-alpha)*(1-t) == (1-alpha) + (2*alpha-1)*t : one FMA.
            loss = ((1.0 - alpha) + (2.0 * alpha - 1.0) * t) * loss

        def _accum(val):
            # (tile_rows,128) -> (tile_rows//8, 8, 128) is layout-preserving;
            # the axis-0 sum is pure VPU vreg adds (cross-lane reduce deferred
            # to the wrapper).
            out_ref[...] += val.reshape(
                tile_rows // SUBLANES, SUBLANES, LANES).sum(axis=0)[None]

        if valid_in_last is None:
            # Every tile is fully valid: no masking work on the hot path.
            _accum(loss)
        else:
            # Only the globally-last tile carries padding / OOB-read lanes;
            # mask them there (select blocks NaN propagation from garbage).
            @pl.when(tile_idx == num_tiles - 1)
            def _tail():
                rid = lax.broadcasted_iota(jnp.int32, (tile_rows, LANES), 0)
                lid = lax.broadcasted_iota(jnp.int32, (tile_rows, LANES), 1)
                _accum(jnp.where(rid * LANES + lid < valid_in_last, loss, 0.0))

            @pl.when(tile_idx < num_tiles - 1)
            def _body():
                _accum(loss)


def sigmoid_focal_loss(pred, target, alpha=0.25, gamma=2.0, reduction="mean"):
    """Pallas equivalent of torchvision.ops.sigmoid_focal_loss."""
    assert pred.shape == target.shape
    if reduction not in ("mean", "sum"):
        # TODO(synk): reduction='none' needs an elementwise output spec; not
        # wired into this streaming-reduction kernel.
        raise NotImplementedError("reduction='none' not implemented")

    n = int(pred.size)
    pred_f = pred.reshape(-1)
    tgt_f = target.reshape(-1)

    # Pad only to the next multiple of 128 lanes (<= 127 elements) and only
    # when needed; all remaining tail handling is in-kernel masking.
    n_pad = pl.cdiv(n, LANES) * LANES
    if n_pad != n:
        pred_f = jnp.pad(pred_f, (0, n_pad - n))
        tgt_f = jnp.pad(tgt_f, (0, n_pad - n))
    rows = n_pad // LANES
    pred2 = pred_f.reshape(rows, LANES)
    tgt2 = tgt_f.reshape(rows, LANES)

    itemsizes = (pred2.dtype.itemsize, tgt2.dtype.itemsize)
    # Sublane packing: tile rows must be a multiple of 8 for 4-byte dtypes,
    # 16 for bf16/fp16, 32 for 1-byte dtypes.
    row_mult = max(8, *(32 // max(s, 1) for s in itemsizes))

    # VMEM-aware tile size: the two double-buffered input streams get ~40% of
    # per-core VMEM, capped at MAX_TILE_ROWS.
    vmem = _vmem_capacity_bytes()
    per_row_bytes = 2 * LANES * sum(itemsizes)           # 2 buffers per stream
    budget_rows = ((int(0.4 * vmem) // per_row_bytes) // row_mult) * row_mult
    tile_rows = min(MAX_TILE_ROWS, max(row_mult, budget_rows),
                    pl.cdiv(rows, row_mult) * row_mult)

    num_tiles = pl.cdiv(rows, tile_rows)
    num_cores = min(_num_tensorcores(), num_tiles)
    tiles_per_core = pl.cdiv(num_tiles, num_cores)

    tile_elems = tile_rows * LANES
    tail = n - (num_tiles - 1) * tile_elems              # valid elems in last tile
    valid_in_last = None if tail == tile_elems else tail  # None => no masking

    kernel = functools.partial(
        _focal_loss_kernel, tile_rows=tile_rows, num_tiles=num_tiles,
        tiles_per_core=tiles_per_core, valid_in_last=valid_in_last,
        alpha=float(alpha), gamma=float(gamma))

    def in_map(c, i):
        # Clamp so the out-of-range tiles of an unevenly split core read
        # in-bounds data; their contribution is skipped in-kernel.
        return (jnp.minimum(c * tiles_per_core + i, num_tiles - 1), 0)

    tile_spec = pl.BlockSpec((tile_rows, LANES), in_map)

    # Scoped-VMEM limit: needed input buffering + headroom, at least the 32 MiB
    # default (raises v5e's 16 MiB default, never exceeds v7x's 64 MiB).
    block_bytes = 2 * tile_rows * LANES * sum(itemsizes)
    vmem_limit = int(min(max(32 << 20, block_bytes + (16 << 20)), vmem))

    # On v7x make the core split real; plain "parallel" elsewhere (size-1 axis).
    core_sem = pltpu.CORE_PARALLEL if num_cores > 1 else "parallel"

    cost = pl.CostEstimate(
        flops=20 * n,
        transcendentals=3 * n,
        bytes_accessed=n_pad * sum(itemsizes) + num_cores * SUBLANES * LANES * 4)

    partials = pl.pallas_call(
        kernel,
        out_shape=jax.ShapeDtypeStruct((num_cores, SUBLANES, LANES),
                                       jnp.float32),
        grid_spec=pltpu.PrefetchScalarGridSpec(
            num_scalar_prefetch=0,
            grid=(num_cores, tiles_per_core),
            in_specs=[tile_spec, tile_spec],
            out_specs=pl.BlockSpec((1, SUBLANES, LANES),
                                   lambda c, i: (c, 0, 0)),
        ),
        compiler_params=pltpu.CompilerParams(
            dimension_semantics=(core_sem, "arbitrary"),
            vmem_limit_bytes=vmem_limit),
        cost_estimate=cost,
    )(pred2, tgt2)

    total = jnp.sum(partials)
    if reduction == "mean":
        return total / n
    return total


class FocalLoss:
    """JAX/Pallas port of the PyTorch FocalLoss module."""

    def __init__(self, alpha: float = 0.25, gamma: float = 2.0,
                 reduction: str = "mean"):
        self.alpha = alpha
        self.gamma = gamma
        self.reduction = reduction

    def __call__(self, pred, target):
        return sigmoid_focal_loss(pred, target, self.alpha, self.gamma,
                                  self.reduction)


def _reference(pred, target, alpha=0.25, gamma=2.0):
    x = pred.astype(jnp.float32).reshape(-1)
    t = target.astype(jnp.float32).reshape(-1)
    p = jax.nn.sigmoid(x)
    ce = jnp.maximum(x, 0.0) - x * t + jnp.log1p(jnp.exp(-jnp.abs(x)))
    p_t = p * t + (1.0 - p) * (1.0 - t)
    loss = ce * (1.0 - p_t) ** gamma
    if alpha >= 0:
        loss = (alpha * t + (1.0 - alpha) * (1.0 - t)) * loss
    return jnp.mean(loss)


if __name__ == "__main__":
    key = jax.random.PRNGKey(0)
    loss_fn = FocalLoss(alpha=0.25, gamma=2.0, reduction="mean")

    # Tolerance relaxed vs. bit-exact because the kernel uses
    # pl.reciprocal(approx=True) for the sigmoid denominator.
    RTOL, ATOL = 5e-3, 1e-6

    # Primary case: NCHW logits / binary targets (dense detection head).
    k1, k2, k3, k4 = jax.random.split(key, 4)
    pred = jax.random.normal(k1, (2, 4, 16, 16), dtype=jnp.float32)
    target = (jax.random.uniform(k2, (2, 4, 16, 16)) > 0.5).astype(jnp.float32)
    loss = jax.block_until_ready(loss_fn(pred, target))
    ref = _reference(pred, target)
    assert jnp.allclose(loss, ref, rtol=RTOL, atol=ATOL), (loss, ref)

    # Tail case: rows not a multiple of 8 (exercises the masked last tile).
    pred2 = jax.random.normal(k3, (2, 4, 16, 17), dtype=jnp.float32)
    target2 = (jax.random.uniform(k4, (2, 4, 16, 17)) > 0.5).astype(jnp.float32)
    loss2 = jax.block_until_ready(loss_fn(pred2, target2))
    ref2 = _reference(pred2, target2)
    assert jnp.allclose(loss2, ref2, rtol=RTOL, atol=ATOL), (loss2, ref2)

    # bf16 pass-through path (halves HBM bytes; math still f32 in-kernel).
    pred3 = pred.astype(jnp.bfloat16)
    loss3 = jax.block_until_ready(loss_fn(pred3, target))
    ref3 = _reference(pred3, target)
    assert jnp.allclose(loss3, ref3, rtol=RTOL, atol=ATOL), (loss3, ref3)

    print("KERNEL_OK")
</pallas_src>

<mosaic_0001>
module attributes {stable_mosaic.version = 11 : i64} {
  func.func @_focal_loss_kernel(%arg0: i32, %arg1: i32, %arg2: memref<16x128xf32, #tpu.memory_space<vmem>>, %arg3: memref<16x128xf32, #tpu.memory_space<vmem>>, %arg4: memref<1x8x128xf32, #tpu.memory_space<vmem>>) attributes {dimension_semantics = [#tpu.dimension_semantics<parallel>, #tpu.dimension_semantics<arbitrary>], iteration_bounds = array<i64: 1, 1>, scalar_prefetch = 0 : i64, scratch_operands = 0 : i64, tpu.core_type = #tpu.core_type<tc>, window_params = [{transform_indices = @transform_0, window_bounds = array<i64: 16, 128>}, {transform_indices = @transform_1, window_bounds = array<i64: 16, 128>}, {transform_indices = @transform_2, window_bounds = array<i64: 1, 8, 128>}]} {
    %c1_i32 = arith.constant 1 : i32
    %0 = arith.muli %arg0, %c1_i32 : i32
    %1 = arith.addi %0, %arg1 : i32
    %c0_i32 = arith.constant 0 : i32
    %2 = arith.cmpi eq, %arg1, %c0_i32 : i32
    %3 = arith.extui %2 : i1 to i32
    %c0_i32_0 = arith.constant 0 : i32
    %4 = arith.cmpi ne, %3, %c0_i32_0 : i32
    scf.if %4 {
      %cst = arith.constant 0.000000e+00 : f32
      %8 = vector.broadcast %cst : f32 to vector<1x8x128xf32>
      %c0 = arith.constant 0 : index
      %c0_3 = arith.constant 0 : index
      %c0_4 = arith.constant 0 : index
      %9 = vector.load %arg4[%c0, %c0_3, %c0_4] : memref<1x8x128xf32, #tpu.memory_space<vmem>>, vector<1x8x128xf32>
      tpu.vector_store %arg4[%c0, %c0_3, %c0_4], %8 {strides = array<i32>} : memref<1x8x128xf32, #tpu.memory_space<vmem>>, vector<1x8x128xf32>,
    } else {
    }
    %c1_i32_1 = arith.constant 1 : i32
    %5 = arith.cmpi slt, %1, %c1_i32_1 : i32
    %6 = arith.extui %5 : i1 to i32
    %c0_i32_2 = arith.constant 0 : i32
    %7 = arith.cmpi ne, %6, %c0_i32_2 : i32
    scf.if %7 {
      %c0 = arith.constant 0 : index
      %c0_3 = arith.constant 0 : index
      %8 = vector.load %arg2[%c0, %c0_3] : memref<16x128xf32, #tpu.memory_space<vmem>>, vector<16x128xf32>
      %c0_4 = arith.constant 0 : index
      %c0_5 = arith.constant 0 : index
      %9 = vector.load %arg3[%c0_4, %c0_5] : memref<16x128xf32, #tpu.memory_space<vmem>>, vector<16x128xf32>
      %10 = math.absf %8 : vector<16x128xf32>
      %cst = arith.constant 0.000000e+00 : f32
      %11 = vector.broadcast %cst : f32 to vector<16x128xf32>
      %12 = arith.subf %11, %10 : vector<16x128xf32>
      %13 = math.exp %12 : vector<16x128xf32>
      %cst_6 = arith.constant 0.000000e+00 : f32
      %14 = vector.broadcast %cst_6 : f32 to vector<16x128xf32>
      %15 = arith.maximumf %8, %14 : vector<16x128xf32>
      %16 = arith.mulf %8, %9 : vector<16x128xf32>
      %17 = arith.subf %15, %16 : vector<16x128xf32>
      %18 = math.log1p %13 : vector<16x128xf32>
      %19 = arith.addf %17, %18 : vector<16x128xf32>
      %cst_7 = arith.constant 0.000000e+00 : f32
      %20 = vector.broadcast %cst_7 : f32 to vector<16x128xf32>
      %21 = arith.cmpf oge, %8, %20 : vector<16x128xf32>
      %cst_8 = arith.constant 1.000000e+00 : f32
      %22 = vector.broadcast %cst_8 : f32 to vector<16x128xf32>
      %23 = arith.select %21, %22, %13 : vector<16x128xi1>, vector<16x128xf32>
      %cst_9 = arith.constant 1.000000e+00 : f32
      %24 = vector.broadcast %cst_9 : f32 to vector<16x128xf32>
      %25 = arith.addf %24, %13 : vector<16x128xf32>
      %26 = tpu.reciprocal %25 {approx = true} : vector<16x128xf32> -> vector<16x128xf32>
      %27 = arith.mulf %23, %26 : vector<16x128xf32>
      %28 = arith.mulf %27, %9 : vector<16x128xf32>
      %cst_10 = arith.constant 1.000000e+00 : f32
      %29 = vector.broadcast %cst_10 : f32 to vector<16x128xf32>
      %30 = arith.subf %29, %27 : vector<16x128xf32>
      %cst_11 = arith.constant 1.000000e+00 : f32
      %31 = vector.broadcast %cst_11 : f32 to vector<16x128xf32>
      %32 = arith.subf %31, %9 : vector<16x128xf32>
      %33 = arith.mulf %30, %32 : vector<16x128xf32>
      %34 = arith.addf %28, %33 : vector<16x128xf32>
      %cst_12 = arith.constant 1.000000e+00 : f32
      %35 = vector.broadcast %cst_12 : f32 to vector<16x128xf32>
      %36 = arith.subf %35, %34 : vector<16x128xf32>
      %37 = arith.mulf %36, %36 : vector<16x128xf32>
      %38 = arith.mulf %19, %37 : vector<16x128xf32>
      %cst_13 = arith.constant -5.000000e-01 : f32
      %39 = vector.broadcast %cst_13 : f32 to vector<16x128xf32>
      %40 = arith.mulf %39, %9 : vector<16x128xf32>
      %cst_14 = arith.constant 7.500000e-01 : f32
      %41 = vector.broadcast %cst_14 : f32 to vector<16x128xf32>
      %42 = arith.addf %41, %40 : vector<16x128xf32>
      %43 = arith.mulf %42, %38 : vector<16x128xf32>
      %c0_15 = arith.constant 0 : index
      %c0_16 = arith.constant 0 : index
      %c0_17 = arith.constant 0 : index
      %44 = vector.load %arg4[%c0_15, %c0_16, %c0_17] : memref<1x8x128xf32, #tpu.memory_space<vmem>>, vector<1x8x128xf32>
      %45 = vector.shape_cast %43 : vector<16x128xf32> to vector<2x8x128xf32>
      %cst_18 = arith.constant dense<0.000000e+00> : vector<8x128xf32>
      %46 = vector.multi_reduction <add>, %45, %cst_18 [0] : vector<2x8x128xf32> to vector<8x128xf32>
      %47 = vector.shape_cast %46 : vector<8x128xf32> to vector<1x8x128xf32>
      %48 = arith.addf %44, %47 : vector<1x8x128xf32>
      %c0_19 = arith.constant 0 : index
      %c0_20 = arith.constant 0 : index
      %c0_21 = arith.constant 0 : index
      %49 = vector.load %arg4[%c0_19, %c0_20, %c0_21] : memref<1x8x128xf32, #tpu.memory_space<vmem>>, vector<1x8x128xf32>
      tpu.vector_store %arg4[%c0_19, %c0_20, %c0_21], %48 {strides = array<i32>} : memref<1x8x128xf32, #tpu.memory_space<vmem>>, vector<1x8x128xf32>,
    } else {
    }
    return
  }
  func.func @transform_0(%arg0: i32, %arg1: i32) -> (i32, i32) {
    %c1_i32 = arith.constant 1 : i32
    %0 = arith.muli %arg0, %c1_i32 : i32
    %1 = arith.addi %0, %arg1 : i32
    %c0_i32 = arith.constant 0 : i32
    %2 = arith.minsi %1, %c0_i32 : i32
    %c0_i32_0 = arith.constant 0 : i32
    %c0_i32_1 = arith.constant 0 : i32
    return %2, %c0_i32_0 : i32, i32
  }
  func.func @transform_1(%arg0: i32, %arg1: i32) -> (i32, i32) {
    %c1_i32 = arith.constant 1 : i32
    %0 = arith.muli %arg0, %c1_i32 : i32
    %1 = arith.addi %0, %arg1 : i32
    %c0_i32 = arith.constant 0 : i32
    %2 = arith.minsi %1, %c0_i32 : i32
    %c0_i32_0 = arith.constant 0 : i32
    %c0_i32_1 = arith.constant 0 : i32
    return %2, %c0_i32_0 : i32, i32
  }
  func.func @transform_2(%arg0: i32, %arg1: i32) -> (i32, i32, i32) {
    %c0_i32 = arith.constant 0 : i32
    %c0_i32_0 = arith.constant 0 : i32
    %c0_i32_1 = arith.constant 0 : i32
    return %arg0, %c0_i32, %c0_i32_0 : i32, i32, i32
  }
}

</mosaic_0001>

<bundles_post_ra>
// kernel: tpu_custom_call.1
= control target key start
LH: loop header
LB: loop body
LE: loop exit
PB: predicated region body
PF: predicated region fallthrough
CT: control target
= control target key end

     0   :  { %7 = vsyncpa [#allocation3], 0  ;;  %s283_s0 = inlined_call_operand.hbm [shape: f32[16,128], index: 0, kind: input, shape index: {}]   ;;  %s284_s1 = inlined_call_operand.hbm [shape: f32[16,128], index: 1, kind: input, shape index: {}]   ;;  %s285_s2 = inlined_call_operand.hbm [shape: f32[1,8,128], index: 2, kind: output, shape index: {}]  }
   0x1   :  { %8 = vsyncpa [#allocation6], 0 }
   0x2   :  { %9 = vsyncpa [#allocation4], 0  ;;  %s248_s9 = smov [#allocation2]  }
   0x3   :  { %s21_s10 = sshll.u32 %s248_s9, 4  ;;  %s22_s10 = int_to_ptr.vmem [resolvable:$true] %s21_s10 }
   0x4   :  { %s190_s11 = scalar_lea.vmem %s22_s10, 256  ;;  %p195_p1 = scmp.lt.s32.totalorder %s22_s10, %s22_s10 }
   0x5   :  { %p191_p0 = scmp.ne.s32.totalorder %s22_s10, %s190_s11  ;;  %p196_p2 = scmp.lt.s32.totalorder %s190_s11, %s190_s11 }
   0x7   :  { %p197_p3 = por %p196_p2, %p195_p1 }
   0x9   :  { %p198_p4 = pnand %p197_p3, %p191_p0 }
   0xb   :  { %201 = shalt.err (!%p198_p4)
}
   0xc   :  { %s249_s12 = smov 128   ;;  %s250_s13 = smov 8  }
   0xd   :  { %27 = dma.hbm_to_vmem [thread:$0]  %s283_s0, 256, %s22_s10, [#allocation3], %s249_s12, %s249_s12, %s250_s13  }
   0xe   :  { %s251_s16 = smov [#allocation5]  }
   0xf   :  { %s39_s17 = sshll.u32 %s251_s16, 4  ;;  %s40_s17 = int_to_ptr.vmem [resolvable:$true] %s39_s17 }
  0x10   :  { %s210_s18 = scalar_lea.vmem %s40_s17, 256  ;;  %p215_p6 = scmp.lt.s32.totalorder %s40_s17, %s40_s17 }
  0x11   :  { %p211_p5 = scmp.ne.s32.totalorder %s40_s17, %s210_s18  ;;  %p216_p7 = scmp.lt.s32.totalorder %s210_s18, %s210_s18 }
  0x13   :  { %p217_p8 = por %p216_p7, %p215_p6 }
  0x15   :  { %p218_p9 = pnand %p217_p8, %p211_p5 }
  0x17   :  { %221 = shalt.err (!%p218_p9)
}
  0x18   :  { %45 = dma.hbm_to_vmem [thread:$0]  %s284_s1, 256, %s40_s17, [#allocation6], %s249_s12, %s249_s12, %s250_s13  }
  0x19   :  { %242 = dma.done.wait [#allocation3], 256  }
  0x1a   :  { %243 = vsyncadd [#allocation3], 4294967040 }
  0x1b   :  { %244 = dma.done.wait [#allocation6], 256  }
  0x1c   :  { %245 = vsyncadd [#allocation6], 4294967040  ;;  %v70_v0 = vld [vmem:[#allocation2] sm:$0xff]  ;;  %v71_v1 = vld [vmem:[#allocation2 + $0x8] sm:$0xff]  ;;  %s252_s0 = smov [#allocation7]  }
  0x1d   :  { %v74_v2 = vand.u32 2147483647, %v70_v0  ;;  %v75_v3 = vand.u32 2147483647, %v71_v1  ;;  %vm108_vm0 = vcmp.ge.f32.partialorder %v70_v0, 0.0  ;;  %vm109_vm1 = vcmp.ge.f32.partialorder %v71_v1, 0.0 }
  0x1e   :  { %v72_v15 = vld [vmem:[#allocation5] sm:$0xff]  ;;  %v73_v16 = vld [vmem:[#allocation5 + $0x8] sm:$0xff]  ;;  %v82_v24 = vmax.f32 %v70_v0, 0.0  ;;  %v83_v25 = vmax.f32 %v71_v1, 0.0  ;;  %s150_s1 = sshll.u32 %s252_s0, 4  ;;  %s151_s1 = int_to_ptr.vmem [resolvable:$true] %s150_s1 }
  0x1f   :  { %v76_v4 = vsub.f32 0.0, %v74_v2  ;;  %v77_v5 = vsub.f32 0.0, %v75_v3  ;;  %v84_v26 = vmul.f32 %v72_v15, %v70_v0  ;;  %v85_v29 = vmul.f32 %v73_v16, %v71_v1  ;;  %s222_s21 = scalar_lea.vmem %s151_s1, 128  ;;  %p227_p11 = scmp.lt.s32.totalorder %s151_s1, %s151_s1 }
  0x20   :  { %v122_v31 = vsub.f32 1.0, %v72_v15  ;;  %v123_v32 = vsub.f32 1.0, %v73_v16  ;;  %v134_v50 = vmul.f32 -0.5, %v72_v15  ;;  %v135_v52 = vmul.f32 -0.5, %v73_v16  ;;  %p223_p10 = scmp.ne.s32.totalorder %s151_s1, %s222_s21  ;;  %p228_p12 = scmp.lt.s32.totalorder %s222_s21, %s222_s21 }
  0x21   :  { %v78_v6 = vmul.f32 1.442695, %v76_v4  ;;  %v80_v7 = vmul.f32 1.442695, %v77_v5  ;;  %v86_v43 = vsub.f32 %v82_v24, %v84_v26  ;;  %v87_v45 = vsub.f32 %v83_v25, %v85_v29 }
  0x22   :  { %v136_v58 = vadd.f32 0.75, %v134_v50  ;;  %v137_v60 = vadd.f32 0.75, %v135_v52  ;;  %p229_p13 = por %p228_p12, %p227_p11 }
  0x23   :  { %170 = vpow2.f32 %v78_v6 }
  0x24   :  { %172 = vpow2.f32 %v80_v7  ;;  %p230_p0 = pnand %p229_p13, %p223_p10 }
  0x30   :  { %v171_v8 = vpop.eup %170 }
  0x31   :  { %v173_v9 = vpop.eup %172  ;;  %v88_v10 = vadd.f32 1.0, %v171_v8  ;;  %v91_v12 = vmul.f32 -0.5, %v171_v8  ;;  %v94_v18 = vand.u32 2147483647, %v171_v8  ;;  %v110_v19 = vsel %vm108_vm0, 1.0, %v171_v8 }
  0x32   :  { %v97_v11 = vadd.f32 1.0, %v173_v9  ;;  %v100_v13 = vmul.f32 -0.5, %v173_v9  ;;  %v111_v22 = vsel %vm109_vm1, 1.0, %v173_v9  ;;  %v103_v27 = vand.u32 2147483647, %v173_v9 }
  0x33   :  { %174 = vlog2.f32 %v88_v10  ;;  %v92_v17 = vadd.f32 1.0, %v91_v12  ;;  %vm274_vm2 = vcmp.lt.f32.partialorder %v94_v18, 0.0004427343 }
  0x34   :  { %176 = vlog2.f32 %v97_v11  ;;  %v101_v21 = vadd.f32 1.0, %v100_v13  ;;  %vm104_vm3 = vcmp.lt.f32.partialorder %v103_v27, 0.0004427343 }
  0x35   :  { %178 = vrcp.f32 %v88_v10  ;;  %v93_v34 = vmul.f32 %v171_v8, %v92_v17 }
  0x36   :  { %180 = vrcp.f32 %v97_v11  ;;  %v102_v38 = vmul.f32 %v173_v9, %v101_v21 }
  0x40   :  { %v175_v14 = vpop.eup %174 }
  0x41   :  { %v177_v20 = vpop.eup %176  ;;  %v90_v33 = vmul.f32 0.6931472, %v175_v14 }
  0x42   :  { %v179_v23 = vpop.eup %178  ;;  %v99_v37 = vmul.f32 0.6931472, %v177_v20 }
  0x43   :  { %v181_v28 = vpop.eup %180  ;;  %v116_v30 = vmul.f32 %v179_v23, %v110_v19  ;;  %v96_v46 = vsel %vm274_vm2, %v93_v34, %v90_v33 }
  0x44   :  { %v117_v36 = vmul.f32 %v181_v28, %v111_v22  ;;  %v105_v48 = vsel %vm104_vm3, %v102_v38, %v99_v37  ;;  %v106_v53 = vadd.f32 %v96_v46, %v86_v43 }
  0x45   :  { %v118_v39 = vmul.f32 %v116_v30, %v72_v15  ;;  %v120_v40 = vsub.f32 1.0, %v116_v30  ;;  %v107_v55 = vadd.f32 %v105_v48, %v87_v45 }
  0x46   :  { %v119_v41 = vmul.f32 %v117_v36, %v73_v16  ;;  %v121_v42 = vsub.f32 1.0, %v117_v36 }
  0x47   :  { %v124_v44 = vmul.f32 %v122_v31, %v120_v40 }
  0x48   :  { %v125_v47 = vmul.f32 %v123_v32, %v121_v42 }
  0x49   :  { %v126_v49 = vadd.f32 %v124_v44, %v118_v39 }
  0x4a   :  { %v127_v51 = vadd.f32 %v125_v47, %v119_v41 }
  0x4b   :  { %v128_v54 = vsub.f32 1.0, %v126_v49 }
  0x4c   :  { %v129_v56 = vsub.f32 1.0, %v127_v51 }
  0x4d   :  { %v130_v57 = vmul.f32 %v128_v54, %v128_v54 }
  0x4e   :  { %v131_v59 = vmul.f32 %v129_v56, %v129_v56 }
  0x4f   :  { %v132_v61 = vmul.f32 %v130_v57, %v106_v53 }
  0x50   :  { %v133_v62 = vmul.f32 %v131_v59, %v107_v55 }
  0x51   :  { %v138_v63 = vmul.f32 %v136_v58, %v132_v61 }
  0x52   :  { %v139_v0 = vmul.f32 %v137_v60, %v133_v62 }
  0x54   :  { %v141_v1 = vadd.f32 %v139_v0, %v138_v63 }
  0x56   :  { %143 = vst [vmem:[#allocation7] sm:$0xff] %v141_v1 }
  0x57   :  { %233 = shalt.err (!%p230_p0)
}
  0x58   :  { %153 = dma.vmem_to_hbm [thread:$0]  %s151_s1, 128, %s285_s2, [#allocation4]  }
  0x59   :  { %246 = dma.done.wait [#allocation4], 128  }
  0x5a   :  { %247 = vsyncadd [#allocation4], 4294967168 }
  0x5b   :  { %157 = vsyncpa [#allocation3], 1 }
  0x5c   :  { %158 = vsyncpa [#allocation6], 1 }
  0x5d   :  { %159 = vsyncpa [#allocation4], 1 }

</bundles_post_ra>
